<compile_context>
chip_gen: v7x
topology: tpu7x:2x2x1
jax: 0.10.0
libtpu: 0.0.40
codegen_flags: <defaults>
</compile_context>

<pallas_src>
import jax
import jax.numpy as jnp
from jax.experimental import pallas as pl
from jax.experimental.pallas import tpu as pltpu

_N_PAD = 128  # lane-dense output width (real logits live in [:, :num_classes])


def _head_kernel(x_ref, w1_ref, b1_ref, w2_ref, b2_ref, o_ref):
    # x_ref : (TB, 2H)  bf16     w1_ref: (2H, H)  bf16    b1_ref: (1, H)   f32
    # w2_ref: (H, 128)  f32      b2_ref: (1, 128) f32     o_ref : (TB, 128) f32
    h = jnp.dot(x_ref[...], w1_ref[...], preferred_element_type=jnp.float32)
    h = jnp.tanh(h + b1_ref[...])                     # VPU add + EUP tanh, f32
    out = jnp.dot(h, w2_ref[...], preferred_element_type=jnp.float32) + b2_ref[...]
    o_ref[...] = out.astype(o_ref.dtype)


def roberta_classification_head(x, w_dense, b_dense, w_out, b_out, *, tb=512):
    """x: (..., H) with trailing pair layout (mirrors torch reshape(-1, 2H)).
       Weights in PyTorch nn.Linear convention:
       w_dense: (H, 2H), b_dense: (H,), w_out: (C, H), b_out: (C,)."""
    # Mirror torch's x.reshape(-1, x.size(-1) * 2)
    x2 = x.reshape(-1, x.shape[-1] * 2)
    B, twoH = x2.shape
    H = w_dense.shape[0]
    C = w_out.shape[0]

    # Batch tile: multiple of 8, capped at `tb`; pad B up to a tile multiple.
    TB = min(tb, ((B + 7) // 8) * 8)
    TB = max(8, (TB // 8) * 8)
    B_pad = ((B + TB - 1) // TB) * TB
    if B_pad != B:
        x2 = jnp.pad(x2, ((0, B_pad - B), (0, 0)))

    # Parameter prep (plain-JAX glue, done once): pre-transpose, pre-cast,
    # and zero-pad the final projection to a lane-dense 128-wide slab.
    x2b = x2.astype(jnp.bfloat16)                                  # (B_pad, 2H)
    w1 = w_dense.T.astype(jnp.bfloat16)                            # (2H, H)
    b1 = b_dense.reshape(1, H).astype(jnp.float32)                 # (1, H)
    w2 = jnp.zeros((H, _N_PAD), jnp.float32).at[:, :C].set(
        w_out.T.astype(jnp.float32))                               # (H, 128)
    b2 = jnp.zeros((1, _N_PAD), jnp.float32).at[:, :C].set(
        b_out.reshape(1, C).astype(jnp.float32))                   # (1, 128)

    grid = (B_pad // TB,)
    out = pl.pallas_call(
        _head_kernel,
        out_shape=jax.ShapeDtypeStruct((B_pad, _N_PAD), jnp.float32),
        grid=grid,
        in_specs=[
            pl.BlockSpec((TB, twoH), lambda i: (i, 0)),    # streamed x tiles
            pl.BlockSpec((twoH, H), lambda i: (0, 0)),     # resident w1
            pl.BlockSpec((1, H), lambda i: (0, 0)),        # resident b1
            pl.BlockSpec((H, _N_PAD), lambda i: (0, 0)),   # resident w2 (padded)
            pl.BlockSpec((1, _N_PAD), lambda i: (0, 0)),   # resident b2 (padded)
        ],
        out_specs=pl.BlockSpec((TB, _N_PAD), lambda i: (i, 0)),
        compiler_params=pltpu.CompilerParams(
            dimension_semantics=("parallel",),
        ),
    )(x2b, w1, b1, w2, b2)

    return out[:B, :C].astype(x.dtype)


if __name__ == "__main__":
    key = jax.random.PRNGKey(0)
    H = 32          # config.hidden_size (small test shape)
    B = 4           # batch of code-pair vectors

    k_x, k_w1, k_b1, k_w2, k_b2 = jax.random.split(key, 5)

    # Input: (B, 2, H) — a pair of pooled code vectors per example.
    x = jax.random.normal(k_x, (B, 2, H), dtype=jnp.float32)

    # Deterministic synthetic parameters (PyTorch nn.Linear shapes).
    w_dense = jax.random.normal(k_w1, (H, 2 * H), dtype=jnp.float32) * 0.05
    b_dense = jax.random.normal(k_b1, (H,), dtype=jnp.float32) * 0.05
    w_out = jax.random.normal(k_w2, (2, H), dtype=jnp.float32) * 0.05
    b_out = jax.random.normal(k_b2, (2,), dtype=jnp.float32) * 0.05

    out = roberta_classification_head(x, w_dense, b_dense, w_out, b_out)
    out = jax.block_until_ready(out)

    # Pure-JAX f32 reference (kernel streams x/w1 in bf16 -> loose tolerance).
    x2 = x.reshape(-1, 2 * H)
    ref = jnp.tanh(x2 @ w_dense.T + b_dense) @ w_out.T + b_out
    assert out.shape == (B, 2)
    assert jnp.allclose(out, ref, atol=2e-2, rtol=2e-2), (
        f"max abs err {jnp.max(jnp.abs(out - ref))}")

    print("KERNEL_OK")
</pallas_src>

<mosaic_0001>
module attributes {stable_mosaic.version = 11 : i64} {
  func.func @_head_kernel(%arg0: i32, %arg1: memref<8x64xbf16, #tpu.memory_space<vmem>>, %arg2: memref<64x32xbf16, #tpu.memory_space<vmem>>, %arg3: memref<1x32xf32, #tpu.memory_space<vmem>>, %arg4: memref<32x128xf32, #tpu.memory_space<vmem>>, %arg5: memref<1x128xf32, #tpu.memory_space<vmem>>, %arg6: memref<8x128xf32, #tpu.memory_space<vmem>>) attributes {dimension_semantics = [#tpu.dimension_semantics<parallel>], iteration_bounds = array<i64: 1>, scalar_prefetch = 0 : i64, scratch_operands = 0 : i64, tpu.core_type = #tpu.core_type<tc>, window_params = [{transform_indices = @transform_0, window_bounds = array<i64: 8, 64>}, {pipeline_mode = #tpu.pipeline_mode<synchronous>, transform_indices = @transform_1, window_bounds = array<i64: 64, 32>}, {pipeline_mode = #tpu.pipeline_mode<synchronous>, transform_indices = @transform_2, window_bounds = array<i64: 1, 32>}, {pipeline_mode = #tpu.pipeline_mode<synchronous>, transform_indices = @transform_3, window_bounds = array<i64: 32, 128>}, {pipeline_mode = #tpu.pipeline_mode<synchronous>, transform_indices = @transform_4, window_bounds = array<i64: 1, 128>}, {transform_indices = @transform_5, window_bounds = array<i64: 8, 128>}]} {
    %c0 = arith.constant 0 : index
    %c0_0 = arith.constant 0 : index
    %0 = vector.load %arg1[%c0, %c0_0] : memref<8x64xbf16, #tpu.memory_space<vmem>>, vector<8x64xbf16>
    %c0_1 = arith.constant 0 : index
    %c0_2 = arith.constant 0 : index
    %1 = vector.load %arg2[%c0_1, %c0_2] : memref<64x32xbf16, #tpu.memory_space<vmem>>, vector<64x32xbf16>
    %cst = arith.constant dense<0.000000e+00> : vector<8x32xf32>
    %2 = tpu.matmul %0, %1, %cst {dimension_numbers = #tpu.dot_dimension_numbers<[1], [0], [0], [1], [0, 0, 1, 1], [], []>} : vector<8x64xbf16>, vector<64x32xbf16>, vector<8x32xf32> -> vector<8x32xf32>
    %c0_3 = arith.constant 0 : index
    %c0_4 = arith.constant 0 : index
    %3 = vector.load %arg3[%c0_3, %c0_4] : memref<1x32xf32, #tpu.memory_space<vmem>>, vector<1x32xf32>
    %4 = vector.broadcast %3 : vector<1x32xf32> to vector<8x32xf32>
    %5 = arith.addf %2, %4 : vector<8x32xf32>
    %6 = math.tanh %5 : vector<8x32xf32>
    %c0_5 = arith.constant 0 : index
    %c0_6 = arith.constant 0 : index
    %7 = vector.load %arg4[%c0_5, %c0_6] : memref<32x128xf32, #tpu.memory_space<vmem>>, vector<32x128xf32>
    %cst_7 = arith.constant dense<0.000000e+00> : vector<8x128xf32>
    %8 = tpu.matmul %6, %7, %cst_7 {dimension_numbers = #tpu.dot_dimension_numbers<[1], [0], [0], [1], [0, 0, 1, 1], [], []>} : vector<8x32xf32>, vector<32x128xf32>, vector<8x128xf32> -> vector<8x128xf32>
    %c0_8 = arith.constant 0 : index
    %c0_9 = arith.constant 0 : index
    %9 = vector.load %arg5[%c0_8, %c0_9] : memref<1x128xf32, #tpu.memory_space<vmem>>, vector<1x128xf32>
    %10 = vector.broadcast %9 : vector<1x128xf32> to vector<8x128xf32>
    %11 = arith.addf %8, %10 : vector<8x128xf32>
    %c0_10 = arith.constant 0 : index
    %c0_11 = arith.constant 0 : index
    %12 = vector.load %arg6[%c0_10, %c0_11] : memref<8x128xf32, #tpu.memory_space<vmem>>, vector<8x128xf32>
    tpu.vector_store %arg6[%c0_10, %c0_11], %11 {strides = array<i32>} : memref<8x128xf32, #tpu.memory_space<vmem>>, vector<8x128xf32>,
    return
  }
  func.func @transform_0(%arg0: i32) -> (i32, i32) {
    %c0_i32 = arith.constant 0 : i32
    %c0_i32_0 = arith.constant 0 : i32
    return %arg0, %c0_i32 : i32, i32
  }
  func.func @transform_1(%arg0: i32) -> (i32, i32) {
    %c0_i32 = arith.constant 0 : i32
    %c0_i32_0 = arith.constant 0 : i32
    %c0_i32_1 = arith.constant 0 : i32
    return %c0_i32, %c0_i32_0 : i32, i32
  }
  func.func @transform_2(%arg0: i32) -> (i32, i32) {
    %c0_i32 = arith.constant 0 : i32
    %c0_i32_0 = arith.constant 0 : i32
    %c0_i32_1 = arith.constant 0 : i32
    return %c0_i32, %c0_i32_0 : i32, i32
  }
  func.func @transform_3(%arg0: i32) -> (i32, i32) {
    %c0_i32 = arith.constant 0 : i32
    %c0_i32_0 = arith.constant 0 : i32
    %c0_i32_1 = arith.constant 0 : i32
    return %c0_i32, %c0_i32_0 : i32, i32
  }
  func.func @transform_4(%arg0: i32) -> (i32, i32) {
    %c0_i32 = arith.constant 0 : i32
    %c0_i32_0 = arith.constant 0 : i32
    %c0_i32_1 = arith.constant 0 : i32
    return %c0_i32, %c0_i32_0 : i32, i32
  }
  func.func @transform_5(%arg0: i32) -> (i32, i32) {
    %c0_i32 = arith.constant 0 : i32
    %c0_i32_0 = arith.constant 0 : i32
    return %arg0, %c0_i32 : i32, i32
  }
}

</mosaic_0001>

<bundles_post_ra>
// kernel: tpu_custom_call.1
= control target key start
LH: loop header
LB: loop body
LE: loop exit
PB: predicated region body
PF: predicated region fallthrough
CT: control target
= control target key end

     0   :  { %v288_v1 = vmov 0.0   ;;  %vm289_vm0 = vmmov 0   ;;  %s367_s0 = inlined_call_operand.vmem [shape: bf16[8,64], index: 0, kind: input, shape index: {}]   ;;  %s368_s1 = inlined_call_operand.vmem [shape: bf16[64,32], index: 1, kind: input, shape index: {}]   ;;  %s369_s2 = inlined_call_operand.vmem [shape: f32[1,32], index: 2, kind: input, shape index: {}]   ;;  %s370_s3 = inlined_call_operand.vmem [shape: f32[32,128], index: 3, kind: input, shape index: {}]   ;;  %s371_s4 = inlined_call_operand.vmem [shape: f32[1,128], index: 4, kind: input, shape index: {}]   ;;  %s372_s5 = inlined_call_operand.hbm [shape: f32[8,128], index: 5, kind: output, shape index: {}]  }
   0x1   :  { %v258_v0 = vld [vmem:[%s368_s1] sm:$0xff]   ;;  %225 = vmatprep.subr.bf16.mxu0 %v288_v1  ;;  %v259_v2 = vld [vmem:[%s368_s1 + $0x8] sm:$0xff]   ;;  %233 = vmatprep.mubr.msk.bf16.mxu0 %vm289_vm0, %v288_v1 }
   0x2   :  { %226 = vmatpush3.bf16.msra.mxu0 %v258_v0  ;;  %245 = vmatprep.mubr.msk.f32.mxu1 %vm289_vm0, %v288_v1 }
   0x3   :  { %227 = vmatprep.subr.bf16.mxu0 %v288_v1 }
   0x4   :  { %10 = vsyncpa [#allocation3], 0  ;;  %v260_v3 = vld [vmem:[%s368_s1 + $0x10] sm:$0xff]   ;;  %v261_v4 = vld [vmem:[%s368_s1 + $0x18] sm:$0xff]   ;;  %vm62_vm1 = vcmask 523264   ;;  %v290_v9 = vmov 0.0|0.0  }
   0x5   :  { %v22_v5 = vld [vmem:[%s367_s0] sm:$0xf]  ;;  %v108_v7 = vld [vmem:[%s370_s3 + $0x8] sm:$0xff]  ;;  %v109_v8 = vld [vmem:[%s370_s3 + $0x10] sm:$0xff]  ;;  %248 = vmatprep.subr.bf16.mxu1 %v290_v9  ;;  %vm118_vm2 = vcmask 261120  }
   0x6   :  { %228 = vmatpush3.bf16.msra.mxu0 %v259_v2  ;;  %v107_v6 = vld [vmem:[%s370_s3] sm:$0xff]  ;;  %v110_v11 = vld [vmem:[%s370_s3 + $0x18] sm:$0xff]  ;;  %s291_s3 = smov [#allocation2]  }
   0x7   :  { %229 = vmatprep.subr.bf16.mxu0 %v288_v1  ;;  %v249_v10 = vpack.c.bf16 %v108_v7, %v107_v6  ;;  %v252_v12 = vpack.c.bf16 %v110_v11, %v109_v8  ;;  %v207_v13 = vld [vmem:[%s369_s2] ss:$0 sm:$0xff]  ;;  %s199_s13 = sshll.u32 %s291_s3, 4  ;;  %s200_s13 = int_to_ptr.vmem [resolvable:$true] %s199_s13 }
   0x8   :  { %v213_v20 = vld [vmem:[%s371_s4] ss:$0 sm:$0xff]  ;;  %s264_s2 = scalar_lea.vmem %s200_s13, 128  ;;  %p269_p1 = scmp.lt.s32.totalorder %s200_s13, %s200_s13 }
   0x9   :  { %250 = vmatpush3.bf16.msra.mxu1 %v249_v10  ;;  %p265_p0 = scmp.ne.s32.totalorder %s200_s13, %s264_s2  ;;  %p270_p2 = scmp.lt.s32.totalorder %s264_s2, %s264_s2 }
   0xa   :  { %230 = vmatpush3.bf16.msra.mxu0 %v260_v3  ;;  %251 = vmatprep.subr.bf16.mxu1 %v290_v9 }
   0xb   :  { %231 = vmatprep.subr.bf16.mxu0 %v288_v1  ;;  %p271_p3 = por %p270_p2, %p269_p1 }
   0xd   :  { %253 = vmatpush3.bf16.msra.mxu1 %v252_v12  ;;  %p272_p4 = pnand %p271_p3, %p265_p0 }
   0xe   :  { %232 = vmatpush3.bf16.msra.mxu0 %v261_v4 }
  0x11   :  { %234 = vmatmul.mubr.msk.bf16.vlgmr.msra.gmra.mrb[0].mxu0 %vm62_vm1, %v22_v5 }
  0xe4   :  { %v100_v14 = vpop.f32.mrb[0].mxu0 }
  0xe5   :  { %v101_v15 = vadd.f32 %v207_v13, %v100_v14  ;;  %v235_v16 = vpop.f32.mrb[1].mxu0 }
  0xe6   :  { %v103_v17 = vpop.f32.mrb[2].mxu0 }
  0xe7   :  { %262 = vtanh.f32 %v101_v15  ;;  %v236_v18 = vpop.f32.mrb[3].mxu0 }
  0xf1   :  { %v263_v19 = vpop.eup %262 }
  0xf2   :  { %246 = vmatmul.mubr.msk.f32.vlgmr.msra.gmra.mrb[0].mxu1 %vm118_vm2, %v263_v19 }
 0x1c5   :  { %v188_v21 = vpop.f32.mrb[0].mxu1 }
 0x1c6   :  { %v189_v22 = vadd.f32 %v213_v20, %v188_v21  ;;  %v247_v23 = vpop.f32.mrb[1].mxu1 }
 0x1c8   :  { %192 = vst [vmem:[#allocation2] sm:$0xff] %v189_v22 }
 0x1c9   :  { %275 = shalt.err (!%p272_p4)
}
 0x1ca   :  { %s276_s16 = scalar_lea.hbm %s372_s5, 128 }
 0x1cb   :  { %p277_p5 = scmp.ne.s32.totalorder %s372_s5, %s276_s16  ;;  %p280_p6 = scmp.lt.u32.totalorder %s276_s16, %s372_s5 }
 0x1cd   :  { %p282_p7 = pnand %p280_p6, %p277_p5 }
 0x1cf   :  { %285 = shalt.err (!%p282_p7)
}
 0x1d0   :  { %202 = dma.vmem_to_hbm [thread:$0]  %s200_s13, 128, %s372_s5, [#allocation3]  }
 0x1d1   :  { %286 = dma.done.wait [#allocation3], 128  }
 0x1d2   :  { %287 = vsyncadd [#allocation3], 4294967168 }
 0x1d3   :  { %206 = vsyncpa [#allocation3], 1 }

</bundles_post_ra>
